<compile_context>
chip_gen: v6e
topology: v6e:2x2x1
jax: 0.10.0
libtpu: 0.0.40
codegen_flags: <defaults>
</compile_context>

<pallas_src>
import math

import jax
import jax.numpy as jnp
from jax.experimental import pallas as pl
from jax.experimental.pallas import tpu as pltpu

_SQRT2 = math.sqrt(2.0)


def _gelu_exact(x):
    # x * 0.5 * (1 + erf(x / sqrt(2)))  -- matches the 'gelu' branch of FeedForward.
    return x * 0.5 * (1.0 + jax.lax.erf(x / _SQRT2))


def _round_up(x, m):
    return (x + m - 1) // m * m


def _physical_vmem_bytes():
    try:
        return int(pltpu.get_tpu_info().vmem_capacity_bytes)
    except Exception:
        return 64 * 1024 * 1024  # conservative: v7x per-TC VMEM


def _lane_alignment():
    # v6e / v7x MXUs are 2x256x256 -> pad features to 256; older gens use 128.
    try:
        kind = jax.devices()[0].device_kind.lower()
    except Exception:
        return 128
    if any(t in kind for t in ("v2", "v3", "v4", "v5")):
        return 128
    return 256


def feedforward_kernel(x_ref, w1_ref, b1_ref, w2_ref, b2_ref, res_ref,
                       o_ref, acc_ref):
    j = pl.program_id(1)

    @pl.when(j == 0)
    def _init():
        acc_ref[...] = jnp.zeros_like(acc_ref)

    # First linear on this hidden chunk (MXU, native dtype inputs, f32 acc) + gelu.
    h = jnp.dot(x_ref[...], w1_ref[...], preferred_element_type=jnp.float32)
    h = h + b1_ref[...].astype(jnp.float32)          # (1, tv) broadcasts
    h = _gelu_exact(h)

    # Second linear: accumulate this hidden chunk's contribution in f32.
    h = h.astype(w2_ref.dtype)                        # back to MXU-native dtype
    acc_ref[...] += jnp.dot(h, w2_ref[...], preferred_element_type=jnp.float32)

    @pl.when(j == pl.num_programs(1) - 1)
    def _finalize():
        # TODO(synk): nn.Dropout layers are identity in eval mode; training-time
        #             stochastic dropout is not implemented here.
        out = (acc_ref[...]
               + b2_ref[...].astype(jnp.float32)      # (1, Dp) broadcasts
               + res_ref[...].astype(jnp.float32))
        o_ref[...] = out.astype(o_ref.dtype)


def feedforward(x, input_tensor, w1, b1, w2, b2, *,
                matmul_dtype=None, tv_target=512, tm_max=1024):
    """x, input_tensor: [B, S, model_dim]; w1: [model_dim, vision_dim];
    b1: [vision_dim]; w2: [vision_dim, model_dim]; b2: [model_dim].
    matmul_dtype: optional dtype (e.g. jnp.bfloat16) for MXU inputs; f32 acc."""
    B, S, model_dim = x.shape
    vision_dim = w1.shape[1]
    rows = B * S
    out_dtype = x.dtype

    align = _lane_alignment()
    Dp = _round_up(model_dim, align)
    Vp_base = _round_up(vision_dim, align)

    mm_dtype = jnp.dtype(matmul_dtype) if matmul_dtype is not None else jnp.dtype(x.dtype)
    act_b = mm_dtype.itemsize
    w_b = mm_dtype.itemsize
    res_b = jnp.dtype(input_tensor.dtype).itemsize
    out_b = jnp.dtype(out_dtype).itemsize

    # Per-generation VMEM budget (v5e/v6e: 128 MiB physical; v7x: 64 MiB per TC).
    phys = _physical_vmem_bytes()
    budget = (phys * 3) // 4
    vmem_limit = int(min(phys - 2 * 1024 * 1024, budget + 16 * 1024 * 1024))

    def vmem_usage(tm_, tv_):
        return (2 * tm_ * Dp * act_b         # x tile (double-buffered)
                + 2 * tm_ * Dp * res_b       # residual tile
                + 2 * tm_ * Dp * out_b       # output tile
                + 2 * Dp * tv_ * w_b         # W1 chunk (double-buffered)
                + 2 * tv_ * Dp * w_b         # W2 chunk (double-buffered)
                + 2 * tv_ * 4 + 2 * Dp * 4   # biases
                + tm_ * Dp * 4               # f32 accumulator scratch
                + tm_ * tv_ * 4)             # f32 gelu intermediate

    tm_cap = max(8, min(tm_max, _round_up(rows, 8)))

    def pick_tm(tv_):
        cand = tm_cap
        while True:
            if vmem_usage(cand, tv_) <= budget:
                return cand
            if cand <= 8:
                return None
            cand = max(8, _round_up(cand // 2, 8))

    # Hidden-dim chunk candidates (descending, align-multiples).
    tv_candidates = []
    t = Vp_base if Vp_base <= tv_target else tv_target
    while True:
        tv_candidates.append(t)
        if t <= align:
            break
        nxt = max(align, (t // 2 // align) * align)
        if nxt >= t:
            break
        t = nxt

    tm = None
    tv = tv_candidates[-1]
    for tv_try in tv_candidates:
        tm_try = pick_tm(tv_try)
        if tm_try is not None:
            tv, tm = tv_try, tm_try
            break
    if tm is None:
        tm = 8  # last resort; rely on vmem_limit headroom

    Vp = _round_up(Vp_base, tv)            # tv must divide Vp exactly (reduction axis)
    grid_rows = pl.cdiv(rows, tm)          # no row padding copy; ragged last block OK
    grid_v = Vp // tv

    # Feature padding only (zero padding is exact) + optional bf16 cast of MXU inputs.
    x2 = x.reshape(rows, model_dim)
    r2 = input_tensor.reshape(rows, model_dim)
    if Dp > model_dim:
        x2 = jnp.pad(x2, ((0, 0), (0, Dp - model_dim)))
        r2 = jnp.pad(r2, ((0, 0), (0, Dp - model_dim)))
    w1p = jnp.pad(w1, ((0, Dp - model_dim), (0, Vp - vision_dim)))
    b1p = jnp.pad(b1, (0, Vp - vision_dim)).reshape(1, Vp)
    w2p = jnp.pad(w2, ((0, Vp - vision_dim), (0, Dp - model_dim)))
    b2p = jnp.pad(b2, (0, Dp - model_dim)).reshape(1, Dp)
    if matmul_dtype is not None:
        x2 = x2.astype(mm_dtype)
        w1p = w1p.astype(mm_dtype)
        w2p = w2p.astype(mm_dtype)
    # biases and residual stay in their original dtype (added in f32 in-kernel).

    bytes_accessed = int(
        x2.size * x2.dtype.itemsize
        + r2.size * r2.dtype.itemsize
        + rows * Dp * out_b
        + grid_rows * (w1p.size * w1p.dtype.itemsize
                       + w2p.size * w2p.dtype.itemsize
                       + b1p.size * b1p.dtype.itemsize
                       + b2p.size * b2p.dtype.itemsize))
    cost = pl.CostEstimate(
        flops=int(2 * rows * Dp * Vp * 2),
        transcendentals=int(rows * Vp),
        bytes_accessed=bytes_accessed,
    )

    row_spec = pl.BlockSpec((tm, Dp), lambda i, j: (i, 0))   # x / residual / out

    out = pl.pallas_call(
        feedforward_kernel,
        out_shape=jax.ShapeDtypeStruct((rows, Dp), out_dtype),
        grid=(grid_rows, grid_v),
        in_specs=[
            row_spec,                                      # x tile (resident across j)
            pl.BlockSpec((Dp, tv), lambda i, j: (0, j)),   # W1 chunk
            pl.BlockSpec((1, tv), lambda i, j: (0, j)),    # b1 chunk
            pl.BlockSpec((tv, Dp), lambda i, j: (j, 0)),   # W2 chunk
            pl.BlockSpec((1, Dp), lambda i, j: (0, 0)),    # b2 (constant / resident)
            row_spec,                                      # residual tile
        ],
        out_specs=row_spec,
        scratch_shapes=[pltpu.VMEM((tm, Dp), jnp.float32)],  # f32 accumulator
        compiler_params=pltpu.CompilerParams(
            dimension_semantics=("parallel", "arbitrary"),   # rows split across TCs (v7x)
            vmem_limit_bytes=vmem_limit,
        ),
        cost_estimate=cost,
    )(x2, w1p, b1p, w2p, b2p, r2)

    return out[:, :model_dim].reshape(B, S, model_dim)


if __name__ == "__main__":
    # Small shapes consistent with the module: batch=2, seq=8,
    # model_dim=32 (cfg.train.model_dim), vision_dim=64 (cfg.train.vision_dim).
    B, S, model_dim, vision_dim = 2, 8, 32, 64

    key = jax.random.PRNGKey(0)
    k_x, k_res, k_w1, k_b1, k_w2, k_b2 = jax.random.split(key, 6)

    x = jax.random.normal(k_x, (B, S, model_dim), dtype=jnp.float32)
    input_tensor = jax.random.normal(k_res, (B, S, model_dim), dtype=jnp.float32)

    # Deterministic parameters (shapes from FeedForward.__init__ / Add_and_LN).
    # Stored as [in, out] so the kernel computes x @ W directly (== x @ W_torch^T).
    w1 = jax.random.normal(k_w1, (model_dim, vision_dim), dtype=jnp.float32) * 0.05
    b1 = jax.random.normal(k_b1, (vision_dim,), dtype=jnp.float32) * 0.05
    w2 = jax.random.normal(k_w2, (vision_dim, model_dim), dtype=jnp.float32) * 0.05
    b2 = jax.random.normal(k_b2, (model_dim,), dtype=jnp.float32) * 0.05

    # Pure-JAX reference.
    h_ref = _gelu_exact(x @ w1 + b1)
    ref = h_ref @ w2 + b2 + input_tensor

    # 1) Exact f32 path.
    out = feedforward(x, input_tensor, w1, b1, w2, b2)
    out = jax.block_until_ready(out)
    assert out.shape == (B, S, model_dim)
    assert jnp.allclose(out, ref, atol=1e-5, rtol=1e-5), "f32 path mismatch vs reference"

    # 2) bf16-MXU path (f32 accumulation; bias/gelu/residual in f32) — looser tolerance.
    out_bf16 = feedforward(x, input_tensor, w1, b1, w2, b2, matmul_dtype=jnp.bfloat16)
    out_bf16 = jax.block_until_ready(out_bf16)
    assert jnp.allclose(out_bf16, ref, atol=5e-2, rtol=5e-2), "bf16 path mismatch vs reference"

    print("KERNEL_OK")
</pallas_src>

<mosaic_0001>
module attributes {stable_mosaic.version = 11 : i64} {
  func.func @feedforward_kernel(%arg0: i32, %arg1: i32, %arg2: memref<16x256xf32, #tpu.memory_space<vmem>>, %arg3: memref<256x256xf32, #tpu.memory_space<vmem>>, %arg4: memref<1x256xf32, #tpu.memory_space<vmem>>, %arg5: memref<256x256xf32, #tpu.memory_space<vmem>>, %arg6: memref<1x256xf32, #tpu.memory_space<vmem>>, %arg7: memref<16x256xf32, #tpu.memory_space<vmem>>, %arg8: memref<16x256xf32, #tpu.memory_space<vmem>>, %arg9: memref<16x256xf32, #tpu.memory_space<vmem>>) attributes {dimension_semantics = [#tpu.dimension_semantics<parallel>, #tpu.dimension_semantics<arbitrary>], iteration_bounds = array<i64: 1, 1>, scalar_prefetch = 0 : i64, scratch_operands = 1 : i64, tpu.core_type = #tpu.core_type<tc>, window_params = [{transform_indices = @transform_0, window_bounds = array<i64: 16, 256>}, {transform_indices = @transform_1, window_bounds = array<i64: 256, 256>}, {transform_indices = @transform_2, window_bounds = array<i64: 1, 256>}, {transform_indices = @transform_3, window_bounds = array<i64: 256, 256>}, {pipeline_mode = #tpu.pipeline_mode<synchronous>, transform_indices = @transform_4, window_bounds = array<i64: 1, 256>}, {transform_indices = @transform_5, window_bounds = array<i64: 16, 256>}, {transform_indices = @transform_6, window_bounds = array<i64: 16, 256>}]} {
    %c0_i32 = arith.constant 0 : i32
    %0 = arith.cmpi eq, %arg1, %c0_i32 : i32
    %1 = arith.extui %0 : i1 to i32
    %c0_i32_0 = arith.constant 0 : i32
    %2 = arith.cmpi ne, %1, %c0_i32_0 : i32
    scf.if %2 {
      %cst_18 = arith.constant 0.000000e+00 : f32
      %25 = vector.broadcast %cst_18 : f32 to vector<16x256xf32>
      %c0_19 = arith.constant 0 : index
      %c0_20 = arith.constant 0 : index
      %26 = vector.load %arg9[%c0_19, %c0_20] : memref<16x256xf32, #tpu.memory_space<vmem>>, vector<16x256xf32>
      tpu.vector_store %arg9[%c0_19, %c0_20], %25 {strides = array<i32>} : memref<16x256xf32, #tpu.memory_space<vmem>>, vector<16x256xf32>,
    } else {
    }
    %c0 = arith.constant 0 : index
    %c0_1 = arith.constant 0 : index
    %3 = vector.load %arg2[%c0, %c0_1] : memref<16x256xf32, #tpu.memory_space<vmem>>, vector<16x256xf32>
    %c0_2 = arith.constant 0 : index
    %c0_3 = arith.constant 0 : index
    %4 = vector.load %arg3[%c0_2, %c0_3] : memref<256x256xf32, #tpu.memory_space<vmem>>, vector<256x256xf32>
    %cst = arith.constant dense<0.000000e+00> : vector<16x256xf32>
    %5 = tpu.matmul %3, %4, %cst {dimension_numbers = #tpu.dot_dimension_numbers<[1], [0], [0], [1], [0, 0, 1, 1], [], []>} : vector<16x256xf32>, vector<256x256xf32>, vector<16x256xf32> -> vector<16x256xf32>
    %c0_4 = arith.constant 0 : index
    %c0_5 = arith.constant 0 : index
    %6 = vector.load %arg4[%c0_4, %c0_5] : memref<1x256xf32, #tpu.memory_space<vmem>>, vector<1x256xf32>
    %7 = vector.broadcast %6 : vector<1x256xf32> to vector<16x256xf32>
    %8 = arith.addf %5, %7 : vector<16x256xf32>
    %cst_6 = arith.constant 5.000000e-01 : f32
    %9 = vector.broadcast %cst_6 : f32 to vector<16x256xf32>
    %10 = arith.mulf %8, %9 : vector<16x256xf32>
    %cst_7 = arith.constant 1.41421354 : f32
    %11 = vector.broadcast %cst_7 : f32 to vector<16x256xf32>
    %12 = arith.divf %8, %11 : vector<16x256xf32>
    %13 = math.erf %12 : vector<16x256xf32>
    %cst_8 = arith.constant 1.000000e+00 : f32
    %14 = vector.broadcast %cst_8 : f32 to vector<16x256xf32>
    %15 = arith.addf %14, %13 : vector<16x256xf32>
    %16 = arith.mulf %10, %15 : vector<16x256xf32>
    %c0_9 = arith.constant 0 : index
    %c0_10 = arith.constant 0 : index
    %17 = vector.load %arg9[%c0_9, %c0_10] : memref<16x256xf32, #tpu.memory_space<vmem>>, vector<16x256xf32>
    %c0_11 = arith.constant 0 : index
    %c0_12 = arith.constant 0 : index
    %18 = vector.load %arg5[%c0_11, %c0_12] : memref<256x256xf32, #tpu.memory_space<vmem>>, vector<256x256xf32>
    %cst_13 = arith.constant dense<0.000000e+00> : vector<16x256xf32>
    %19 = tpu.matmul %16, %18, %cst_13 {dimension_numbers = #tpu.dot_dimension_numbers<[1], [0], [0], [1], [0, 0, 1, 1], [], []>} : vector<16x256xf32>, vector<256x256xf32>, vector<16x256xf32> -> vector<16x256xf32>
    %20 = arith.addf %17, %19 : vector<16x256xf32>
    %c0_14 = arith.constant 0 : index
    %c0_15 = arith.constant 0 : index
    %21 = vector.load %arg9[%c0_14, %c0_15] : memref<16x256xf32, #tpu.memory_space<vmem>>, vector<16x256xf32>
    tpu.vector_store %arg9[%c0_14, %c0_15], %20 {strides = array<i32>} : memref<16x256xf32, #tpu.memory_space<vmem>>, vector<16x256xf32>,
    %c0_i32_16 = arith.constant 0 : i32
    %22 = arith.cmpi eq, %arg1, %c0_i32_16 : i32
    %23 = arith.extui %22 : i1 to i32
    %c0_i32_17 = arith.constant 0 : i32
    %24 = arith.cmpi ne, %23, %c0_i32_17 : i32
    scf.if %24 {
      %c0_18 = arith.constant 0 : index
      %c0_19 = arith.constant 0 : index
      %25 = vector.load %arg9[%c0_18, %c0_19] : memref<16x256xf32, #tpu.memory_space<vmem>>, vector<16x256xf32>
      %c0_20 = arith.constant 0 : index
      %c0_21 = arith.constant 0 : index
      %26 = vector.load %arg6[%c0_20, %c0_21] : memref<1x256xf32, #tpu.memory_space<vmem>>, vector<1x256xf32>
      %27 = vector.broadcast %26 : vector<1x256xf32> to vector<16x256xf32>
      %28 = arith.addf %25, %27 : vector<16x256xf32>
      %c0_22 = arith.constant 0 : index
      %c0_23 = arith.constant 0 : index
      %29 = vector.load %arg7[%c0_22, %c0_23] : memref<16x256xf32, #tpu.memory_space<vmem>>, vector<16x256xf32>
      %30 = arith.addf %28, %29 : vector<16x256xf32>
      %c0_24 = arith.constant 0 : index
      %c0_25 = arith.constant 0 : index
      %31 = vector.load %arg8[%c0_24, %c0_25] : memref<16x256xf32, #tpu.memory_space<vmem>>, vector<16x256xf32>
      tpu.vector_store %arg8[%c0_24, %c0_25], %30 {strides = array<i32>} : memref<16x256xf32, #tpu.memory_space<vmem>>, vector<16x256xf32>,
    } else {
    }
    return
  }
  func.func @transform_0(%arg0: i32, %arg1: i32) -> (i32, i32) {
    %c0_i32 = arith.constant 0 : i32
    %c0_i32_0 = arith.constant 0 : i32
    return %arg0, %c0_i32 : i32, i32
  }
  func.func @transform_1(%arg0: i32, %arg1: i32) -> (i32, i32) {
    %c0_i32 = arith.constant 0 : i32
    %c0_i32_0 = arith.constant 0 : i32
    return %c0_i32, %arg1 : i32, i32
  }
  func.func @transform_2(%arg0: i32, %arg1: i32) -> (i32, i32) {
    %c0_i32 = arith.constant 0 : i32
    %c0_i32_0 = arith.constant 0 : i32
    return %c0_i32, %arg1 : i32, i32
  }
  func.func @transform_3(%arg0: i32, %arg1: i32) -> (i32, i32) {
    %c0_i32 = arith.constant 0 : i32
    %c0_i32_0 = arith.constant 0 : i32
    return %arg1, %c0_i32 : i32, i32
  }
  func.func @transform_4(%arg0: i32, %arg1: i32) -> (i32, i32) {
    %c0_i32 = arith.constant 0 : i32
    %c0_i32_0 = arith.constant 0 : i32
    %c0_i32_1 = arith.constant 0 : i32
    return %c0_i32, %c0_i32_0 : i32, i32
  }
  func.func @transform_5(%arg0: i32, %arg1: i32) -> (i32, i32) {
    %c0_i32 = arith.constant 0 : i32
    %c0_i32_0 = arith.constant 0 : i32
    return %arg0, %c0_i32 : i32, i32
  }
  func.func @transform_6(%arg0: i32, %arg1: i32) -> (i32, i32) {
    %c0_i32 = arith.constant 0 : i32
    %c0_i32_0 = arith.constant 0 : i32
    return %arg0, %c0_i32 : i32, i32
  }
}

</mosaic_0001>

<bundles_post_ra>
// kernel: tpu_custom_call.1
= control target key start
LH: loop header
LB: loop body
LE: loop exit
PB: predicated region body
PF: predicated region fallthrough
CT: control target
= control target key end

     0   :  { %11 = vsyncpa [#allocation4], 0  ;;  %s673_s0 = inlined_call_operand.hbm [shape: f32[16,256], index: 0, kind: input, shape index: {}]   ;;  %s674_s1 = inlined_call_operand.hbm [shape: f32[256,256], index: 1, kind: input, shape index: {}]   ;;  %s675_s2 = inlined_call_operand.vmem [shape: f32[1,256], index: 2, kind: input, shape index: {}]   ;;  %s676_s3 = inlined_call_operand.hbm [shape: f32[256,256], index: 3, kind: input, shape index: {}]   ;;  %s677_s4 = inlined_call_operand.vmem [shape: f32[1,256], index: 4, kind: input, shape index: {}]   ;;  %s678_s5 = inlined_call_operand.hbm [shape: f32[16,256], index: 5, kind: input, shape index: {}]   ;;  %s679_s6 = inlined_call_operand.hbm [shape: f32[16,256], index: 6, kind: output, shape index: {}]  }
   0x1   :  { %12 = vsyncpa [#allocation7], 0 }
   0x2   :  { %13 = vsyncpa [#allocation10], 0 }
   0x3   :  { %14 = vsyncpa [#allocation5], 0  ;;  %s595_s21 = smov [#allocation6]   ;;  %s596_s23 = smov [#allocation3]  }
   0x4   :  { %s32_s22 = sshll.u32 %s595_s21, 4  ;;  %s20_s24 = sshll.u32 %s596_s23, 4  ;;  %s33_s22 = int_to_ptr.vmem [resolvable:$true] %s32_s22  ;;  %s21_s24 = int_to_ptr.vmem [resolvable:$true] %s20_s24 }
   0x5   :  { %s495_s25 = scalar_lea.vmem %s33_s22, 8192  ;;  %p500_p1 = scmp.lt.s32.totalorder %s33_s22, %s33_s22 }
   0x6   :  { %p496_p0 = scmp.ne.s32.totalorder %s33_s22, %s495_s25  ;;  %p501_p2 = scmp.lt.s32.totalorder %s495_s25, %s495_s25 }
   0x8   :  { %p502_p3 = por %p501_p2, %p500_p1 }
   0xa   :  { %p503_p4 = pnand %p502_p3, %p496_p0 }
   0xc   :  { %506 = shalt.err (!%p503_p4)
}
   0xd   :  { %s597_s26 = smov 256   ;;  %s598_s27 = smov 16  }
   0xe   :  { %38 = dma.hbm_to_vmem [thread:$0]  %s674_s1, 8192, %s33_s22, [#allocation7], %s597_s26, %s597_s26, %s598_s27  }
   0xf   :  { %s515_s30 = scalar_lea.vmem %s21_s24, 512  ;;  %p520_p6 = scmp.lt.s32.totalorder %s21_s24, %s21_s24 }
  0x10   :  { %p516_p5 = scmp.ne.s32.totalorder %s21_s24, %s515_s30  ;;  %p521_p7 = scmp.lt.s32.totalorder %s515_s30, %s515_s30 }
  0x12   :  { %p522_p8 = por %p521_p7, %p520_p6 }
  0x14   :  { %p523_p9 = pnand %p522_p8, %p516_p5 }
  0x16   :  { %526 = shalt.err (!%p523_p9)
}
  0x17   :  { %26 = dma.hbm_to_vmem [thread:$0]  %s673_s0, 512, %s21_s24, [#allocation4], %s597_s26, %s597_s26, %s598_s27  }
  0x18   :  { %s599_s9 = smov [#allocation8]   ;;  %s600_s11 = smov [#allocation9]  }
  0x19   :  { %s46_s10 = sshll.u32 %s599_s9, 4  ;;  %s60_s12 = sshll.u32 %s600_s11, 4  ;;  %s47_s10 = int_to_ptr.vmem [resolvable:$true] %s46_s10  ;;  %s61_s12 = int_to_ptr.vmem [resolvable:$true] %s60_s12 }
  0x1a   :  { %s535_s1 = scalar_lea.vmem %s47_s10, 8192  ;;  %p540_p11 = scmp.lt.s32.totalorder %s47_s10, %s47_s10 }
  0x1b   :  { %p536_p10 = scmp.ne.s32.totalorder %s47_s10, %s535_s1  ;;  %p541_p12 = scmp.lt.s32.totalorder %s535_s1, %s535_s1 }
  0x1d   :  { %p542_p13 = por %p541_p12, %p540_p11 }
  0x1f   :  { %p543_p0 = pnand %p542_p13, %p536_p10 }
  0x21   :  { %546 = shalt.err (!%p543_p0)
}
  0x22   :  { %52 = dma.hbm_to_vmem [thread:$0]  %s676_s3, 8192, %s47_s10, [#allocation7], %s597_s26, %s597_s26, %s598_s27  }
  0x23   :  { %s555_s0 = scalar_lea.vmem %s61_s12, 512  ;;  %p560_p2 = scmp.lt.s32.totalorder %s61_s12, %s61_s12 }
  0x24   :  { %p556_p1 = scmp.ne.s32.totalorder %s61_s12, %s555_s0  ;;  %p561_p3 = scmp.lt.s32.totalorder %s555_s0, %s555_s0 }
  0x26   :  { %p562_p4 = por %p561_p3, %p560_p2 }
  0x28   :  { %p563_p5 = pnand %p562_p4, %p556_p1 }
  0x2a   :  { %566 = shalt.err (!%p563_p5)
}
  0x2b   :  { %66 = dma.hbm_to_vmem [thread:$0]  %s678_s5, 512, %s61_s12, [#allocation10], %s597_s26, %s597_s26, %s598_s27  }
  0x2c   :  { %587 = dma.done.wait [#allocation4], 512  }
  0x2d   :  { %588 = vsyncadd [#allocation4], 4294966784 }
  0x2e   :  { %589 = dma.done.wait [#allocation7], 16384  }
  0x2f   :  { %590 = vsyncadd [#allocation7], 4294950912 }
  0x30   :  { %591 = dma.done.wait [#allocation10], 512  }
  0x31   :  { %592 = vsyncadd [#allocation10], 4294966784  ;;  %v122_v0 = vld [vmem:[#allocation6 + $0xf8] sm:$0xff]  ;;  %v121_v1 = vld [vmem:[#allocation6 + $0xf0] sm:$0xff]  ;;  %s601_s18 = smov [#allocation11]  }
  0x32   :  { %v120_v2 = vld [vmem:[#allocation6 + $0xe8] sm:$0xff]  ;;  %167 = vmatprep.subr.mxu0 %v122_v0  ;;  %v119_v3 = vld [vmem:[#allocation6 + $0xe0] sm:$0xff]  ;;  %v118_v4 = vld [vmem:[#allocation6 + $0xd8] sm:$0xff]  ;;  %s458_s19 = sshll.u32 %s601_s18, 4  ;;  %s459_s19 = int_to_ptr.vmem [resolvable:$true] %s458_s19 }
  0x33   :  { %168 = vmatpush1.msra.mxu0 %v121_v1  ;;  %v117_v5 = vld [vmem:[#allocation6 + $0xd0] sm:$0xff]  ;;  %v116_v6 = vld [vmem:[#allocation6 + $0xc8] sm:$0xff]  ;;  %v115_v7 = vld [vmem:[#allocation6 + $0xc0] sm:$0xff]  ;;  %p572_p7 = scmp.lt.s32.totalorder %s459_s19, %s459_s19 }
  0x34   :  { %169 = vmatprep.subr.mxu0 %v120_v2  ;;  %v114_v8 = vld [vmem:[#allocation6 + $0xb8] sm:$0xff]  ;;  %v113_v9 = vld [vmem:[#allocation6 + $0xb0] sm:$0xff]  ;;  %v112_v10 = vld [vmem:[#allocation6 + $0xa8] sm:$0xff] }
  0x35   :  { %170 = vmatpush1.msra.mxu0 %v119_v3  ;;  %v111_v11 = vld [vmem:[#allocation6 + $0xa0] sm:$0xff]  ;;  %v110_v12 = vld [vmem:[#allocation6 + $0x98] sm:$0xff]  ;;  %v109_v13 = vld [vmem:[#allocation6 + $0x90] sm:$0xff] }
  0x36   :  { %171 = vmatprep.subr.mxu0 %v118_v4  ;;  %v108_v14 = vld [vmem:[#allocation6 + $0x88] sm:$0xff]  ;;  %v107_v15 = vld [vmem:[#allocation6 + $0x80] sm:$0xff]  ;;  %v106_v16 = vld [vmem:[#allocation6 + $0x78] sm:$0xff] }
  0x37   :  { %172 = vmatpush1.msra.mxu0 %v117_v5  ;;  %v105_v17 = vld [vmem:[#allocation6 + $0x70] sm:$0xff]  ;;  %v104_v18 = vld [vmem:[#allocation6 + $0x68] sm:$0xff]  ;;  %v103_v19 = vld [vmem:[#allocation6 + $0x60] sm:$0xff] }
  0x38   :  { %173 = vmatprep.subr.mxu0 %v116_v6  ;;  %v102_v20 = vld [vmem:[#allocation6 + $0x58] sm:$0xff]  ;;  %v101_v21 = vld [vmem:[#allocation6 + $0x50] sm:$0xff]  ;;  %v100_v22 = vld [vmem:[#allocation6 + $0x48] sm:$0xff] }
  0x39   :  { %174 = vmatpush1.msra.mxu0 %v115_v7  ;;  %v99_v23 = vld [vmem:[#allocation6 + $0x40] sm:$0xff]  ;;  %v88_v24 = vld [vmem:[#allocation3 + $0x8] sm:$0xff]  ;;  %v98_v25 = vld [vmem:[#allocation6 + $0x38] sm:$0xff] }
  0x3a   :  { %175 = vmatprep.subr.mxu0 %v114_v8  ;;  %v97_v26 = vld [vmem:[#allocation6 + $0x30] sm:$0xff]  ;;  %231 = vmatprep.mubr.f32.mxu0 %v88_v24  ;;  %v300_v27 = vld [vmem:[#allocation8 + $0xf8] sm:$0xff]  ;;  %v298_v29 = vld [vmem:[#allocation8 + $0xe8] sm:$0xff] }
  0x3b   :  { %176 = vmatpush1.msra.mxu0 %v113_v9  ;;  %333 = vmatprep.subr.mxu1 %v300_v27  ;;  %v299_v28 = vld [vmem:[#allocation8 + $0xf0] sm:$0xff]  ;;  %v297_v30 = vld [vmem:[#allocation8 + $0xe0] sm:$0xff]  ;;  %v96_v31 = vld [vmem:[#allocation6 + $0x28] sm:$0xff] }
  0x3c   :  { %177 = vmatprep.subr.mxu0 %v112_v10  ;;  %334 = vmatpush1.msra.mxu1 %v299_v28  ;;  %v296_v32 = vld [vmem:[#allocation8 + $0xd8] sm:$0xff]  ;;  %v95_v33 = vld [vmem:[#allocation6 + $0x20] sm:$0xff]  ;;  %v295_v34 = vld [vmem:[#allocation8 + $0xd0] sm:$0xff] }
  0x3d   :  { %178 = vmatpush1.msra.mxu0 %v111_v11  ;;  %335 = vmatprep.subr.mxu1 %v298_v29  ;;  %v94_v35 = vld [vmem:[#allocation6 + $0x18] sm:$0xff]  ;;  %v294_v36 = vld [vmem:[#allocation8 + $0xc8] sm:$0xff]  ;;  %v93_v37 = vld [vmem:[#allocation6 + $0x10] sm:$0xff] }
  0x3e   :  { %179 = vmatprep.subr.mxu0 %v110_v12  ;;  %336 = vmatpush1.msra.mxu1 %v297_v30  ;;  %v293_v38 = vld [vmem:[#allocation8 + $0xc0] sm:$0xff]  ;;  %v92_v39 = vld [vmem:[#allocation6 + $0x8] sm:$0xff]  ;;  %v292_v40 = vld [vmem:[#allocation8 + $0xb8] sm:$0xff] }
  0x3f   :  { %180 = vmatpush1.msra.mxu0 %v109_v13  ;;  %337 = vmatprep.subr.mxu1 %v296_v32  ;;  %v91_v41 = vld [vmem:[#allocation6] sm:$0xff]  ;;  %v291_v42 = vld [vmem:[#allocation8 + $0xb0] sm:$0xff]  ;;  %v154_v43 = vld [vmem:[#allocation6 + $0x1f8] sm:$0xff] }
  0x40   :  { %181 = vmatprep.subr.mxu0 %v108_v14  ;;  %338 = vmatpush1.msra.mxu1 %v295_v34  ;;  %v290_v44 = vld [vmem:[#allocation8 + $0xa8] sm:$0xff]  ;;  %v153_v45 = vld [vmem:[#allocation6 + $0x1f0] sm:$0xff]  ;;  %v289_v46 = vld [vmem:[#allocation8 + $0xa0] sm:$0xff] }
  0x41   :  { %182 = vmatpush1.msra.mxu0 %v107_v15  ;;  %339 = vmatprep.subr.mxu1 %v294_v36  ;;  %v152_v47 = vld [vmem:[#allocation6 + $0x1e8] sm:$0xff]  ;;  %v288_v48 = vld [vmem:[#allocation8 + $0x98] sm:$0xff]  ;;  %v151_v49 = vld [vmem:[#allocation6 + $0x1e0] sm:$0xff] }
  0x42   :  { %183 = vmatprep.subr.mxu0 %v106_v16  ;;  %340 = vmatpush1.msra.mxu1 %v293_v38  ;;  %v287_v50 = vld [vmem:[#allocation8 + $0x90] sm:$0xff]  ;;  %v150_v51 = vld [vmem:[#allocation6 + $0x1d8] sm:$0xff]  ;;  %v286_v52 = vld [vmem:[#allocation8 + $0x88] sm:$0xff] }
  0x43   :  { %184 = vmatpush1.msra.mxu0 %v105_v17  ;;  %341 = vmatprep.subr.mxu1 %v292_v40  ;;  %v149_v53 = vld [vmem:[#allocation6 + $0x1d0] sm:$0xff]  ;;  %v285_v54 = vld [vmem:[#allocation8 + $0x80] sm:$0xff]  ;;  %v148_v55 = vld [vmem:[#allocation6 + $0x1c8] sm:$0xff] }
  0x44   :  { %185 = vmatprep.subr.mxu0 %v104_v18  ;;  %342 = vmatpush1.msra.mxu1 %v291_v42  ;;  %v284_v56 = vld [vmem:[#allocation8 + $0x78] sm:$0xff]  ;;  %v147_v57 = vld [vmem:[#allocation6 + $0x1c0] sm:$0xff]  ;;  %v283_v58 = vld [vmem:[#allocation8 + $0x70] sm:$0xff] }
  0x45   :  { %186 = vmatpush1.msra.mxu0 %v103_v19  ;;  %343 = vmatprep.subr.mxu1 %v290_v44  ;;  %v146_v59 = vld [vmem:[#allocation6 + $0x1b8] sm:$0xff]  ;;  %v282_v60 = vld [vmem:[#allocation8 + $0x68] sm:$0xff]  ;;  %v145_v61 = vld [vmem:[#allocation6 + $0x1b0] sm:$0xff] }
  0x46   :  { %187 = vmatprep.subr.mxu0 %v102_v20  ;;  %344 = vmatpush1.msra.mxu1 %v289_v46  ;;  %v281_v62 = vld [vmem:[#allocation8 + $0x60] sm:$0xff]  ;;  %v144_v63 = vld [vmem:[#allocation6 + $0x1a8] sm:$0xff]  ;;  %v280_v0 = vld [vmem:[#allocation8 + $0x58] sm:$0xff] }
  0x47   :  { %188 = vmatpush1.msra.mxu0 %v101_v21  ;;  %345 = vmatprep.subr.mxu1 %v288_v48  ;;  %v143_v1 = vld [vmem:[#allocation6 + $0x1a0] sm:$0xff]  ;;  %v279_v2 = vld [vmem:[#allocation8 + $0x50] sm:$0xff]  ;;  %v142_v3 = vld [vmem:[#allocation6 + $0x198] sm:$0xff] }
  0x48   :  { %189 = vmatprep.subr.mxu0 %v100_v22  ;;  %346 = vmatpush1.msra.mxu1 %v287_v50  ;;  %v278_v4 = vld [vmem:[#allocation8 + $0x48] sm:$0xff]  ;;  %v141_v5 = vld [vmem:[#allocation6 + $0x190] sm:$0xff]  ;;  %v277_v6 = vld [vmem:[#allocation8 + $0x40] sm:$0xff] }
  0x49   :  { %190 = vmatpush1.msra.mxu0 %v99_v23  ;;  %347 = vmatprep.subr.mxu1 %v286_v52  ;;  %v140_v7 = vld [vmem:[#allocation6 + $0x188] sm:$0xff]  ;;  %v276_v8 = vld [vmem:[#allocation8 + $0x38] sm:$0xff]  ;;  %v139_v9 = vld [vmem:[#allocation6 + $0x180] sm:$0xff] }
  0x4a   :  { %191 = vmatprep.subr.mxu0 %v98_v25  ;;  %348 = vmatpush1.msra.mxu1 %v285_v54  ;;  %v275_v10 = vld [vmem:[#allocation8 + $0x30] sm:$0xff]  ;;  %v138_v11 = vld [vmem:[#allocation6 + $0x178] sm:$0xff]  ;;  %v274_v12 = vld [vmem:[#allocation8 + $0x28] sm:$0xff] }
  0x4b   :  { %192 = vmatpush1.msra.mxu0 %v97_v26  ;;  %349 = vmatprep.subr.mxu1 %v284_v56  ;;  %v137_v13 = vld [vmem:[#allocation6 + $0x170] sm:$0xff]  ;;  %v273_v14 = vld [vmem:[#allocation8 + $0x20] sm:$0xff]  ;;  %v136_v15 = vld [vmem:[#allocation6 + $0x168] sm:$0xff] }
  0x4c   :  { %193 = vmatprep.subr.mxu0 %v96_v31  ;;  %350 = vmatpush1.msra.mxu1 %v283_v58  ;;  %v272_v16 = vld [vmem:[#allocation8 + $0x18] sm:$0xff]  ;;  %v135_v17 = vld [vmem:[#allocation6 + $0x160] sm:$0xff]  ;;  %v271_v18 = vld [vmem:[#allocation8 + $0x10] sm:$0xff] }
  0x4d   :  { %194 = vmatpush1.msra.mxu0 %v95_v33  ;;  %351 = vmatprep.subr.mxu1 %v282_v60  ;;  %v134_v19 = vld [vmem:[#allocation6 + $0x158] sm:$0xff]  ;;  %v270_v20 = vld [vmem:[#allocation8 + $0x8] sm:$0xff]  ;;  %v133_v21 = vld [vmem:[#allocation6 + $0x150] sm:$0xff] }
  0x4e   :  { %195 = vmatprep.subr.mxu0 %v94_v35  ;;  %352 = vmatpush1.msra.mxu1 %v281_v62  ;;  %v269_v22 = vld [vmem:[#allocation8] sm:$0xff]  ;;  %v132_v23 = vld [vmem:[#allocation6 + $0x148] sm:$0xff]  ;;  %v332_v24 = vld [vmem:[#allocation8 + $0x1f8] sm:$0xff] }
  0x4f   :  { %196 = vmatpush1.msra.mxu0 %v93_v37  ;;  %353 = vmatprep.subr.mxu1 %v280_v0  ;;  %v131_v25 = vld [vmem:[#allocation6 + $0x140] sm:$0xff]  ;;  %v331_v26 = vld [vmem:[#allocation8 + $0x1f0] sm:$0xff]  ;;  %v130_v27 = vld [vmem:[#allocation6 + $0x138] sm:$0xff] }
  0x50   :  { %197 = vmatprep.subr.mxu0 %v92_v39  ;;  %354 = vmatpush1.msra.mxu1 %v279_v2  ;;  %v330_v28 = vld [vmem:[#allocation8 + $0x1e8] sm:$0xff]  ;;  %v129_v29 = vld [vmem:[#allocation6 + $0x130] sm:$0xff]  ;;  %v329_v30 = vld [vmem:[#allocation8 + $0x1e0] sm:$0xff] }
  0x51   :  { %198 = vmatpush1.msra.mxu0 %v91_v41  ;;  %355 = vmatprep.subr.mxu1 %v278_v4  ;;  %v128_v31 = vld [vmem:[#allocation6 + $0x128] sm:$0xff]  ;;  %v328_v32 = vld [vmem:[#allocation8 + $0x1d8] sm:$0xff]  ;;  %v127_v33 = vld [vmem:[#allocation6 + $0x120] sm:$0xff]  ;;  %v157_v4 = vlaneseq }
  0x52   :  { %199 = vmatprep.subr.mxu0 %v154_v43  ;;  %356 = vmatpush1.msra.mxu1 %v277_v6  ;;  %v327_v34 = vld [vmem:[#allocation8 + $0x1d0] sm:$0xff]  ;;  %v126_v35 = vld [vmem:[#allocation6 + $0x118] sm:$0xff]  ;;  %v124_v37 = vld [vmem:[#allocation6 + $0x108] sm:$0xff] }
  0x53   :  { %200 = vmatpush2.msra.mxu0 %v153_v45  ;;  %357 = vmatprep.subr.mxu1 %v276_v8  ;;  %v125_v36 = vld [vmem:[#allocation6 + $0x110] sm:$0xff]  ;;  %v123_v38 = vld [vmem:[#allocation6 + $0x100] sm:$0xff]  ;;  %v90_v40 = vld [vmem:[#allocation3 + $0x18] sm:$0xff] }
  0x54   :  { %201 = vmatprep.subr.mxu0 %v152_v47  ;;  %358 = vmatpush1.msra.mxu1 %v275_v10  ;;  %v87_v39 = vld [vmem:[#allocation3] sm:$0xff]  ;;  %v89_v41 = vld [vmem:[#allocation3 + $0x10] sm:$0xff]  ;;  %v326_v42 = vld [vmem:[#allocation8 + $0x1c8] sm:$0xff] }
  0x55   :  { %202 = vmatpush2.msra.mxu0 %v151_v49  ;;  %359 = vmatprep.subr.mxu1 %v274_v12  ;;  %v325_v43 = vld [vmem:[#allocation8 + $0x1c0] sm:$0xff]  ;;  %v324_v44 = vld [vmem:[#allocation8 + $0x1b8] sm:$0xff]  ;;  %v323_v45 = vld [vmem:[#allocation8 + $0x1b0] sm:$0xff] }
  0x56   :  { %203 = vmatprep.subr.mxu0 %v150_v51  ;;  %360 = vmatpush1.msra.mxu1 %v273_v14  ;;  %v322_v46 = vld [vmem:[#allocation8 + $0x1a8] sm:$0xff]  ;;  %v321_v47 = vld [vmem:[#allocation8 + $0x1a0] sm:$0xff]  ;;  %v320_v48 = vld [vmem:[#allocation8 + $0x198] sm:$0xff] }
  0x57   :  { %204 = vmatpush2.msra.mxu0 %v149_v53  ;;  %361 = vmatprep.subr.mxu1 %v272_v16  ;;  %v319_v49 = vld [vmem:[#allocation8 + $0x190] sm:$0xff]  ;;  %v318_v50 = vld [vmem:[#allocation8 + $0x188] sm:$0xff]  ;;  %v317_v51 = vld [vmem:[#allocation8 + $0x180] sm:$0xff] }
  0x58   :  { %205 = vmatprep.subr.mxu0 %v148_v55  ;;  %362 = vmatpush1.msra.mxu1 %v271_v18  ;;  %v316_v52 = vld [vmem:[#allocation8 + $0x178] sm:$0xff]  ;;  %v315_v53 = vld [vmem:[#allocation8 + $0x170] sm:$0xff]  ;;  %v314_v54 = vld [vmem:[#allocation8 + $0x168] sm:$0xff] }
  0x59   :  { %206 = vmatpush2.msra.mxu0 %v147_v57  ;;  %363 = vmatprep.subr.mxu1 %v270_v20  ;;  %v313_v55 = vld [vmem:[#allocation8 + $0x160] sm:$0xff]  ;;  %v312_v56 = vld [vmem:[#allocation8 + $0x158] sm:$0xff]  ;;  %v311_v57 = vld [vmem:[#allocation8 + $0x150] sm:$0xff] }
  0x5a   :  { %207 = vmatprep.subr.mxu0 %v146_v59  ;;  %364 = vmatpush1.msra.mxu1 %v269_v22  ;;  %v310_v58 = vld [vmem:[#allocation8 + $0x148] sm:$0xff]  ;;  %v309_v59 = vld [vmem:[#allocation8 + $0x140] sm:$0xff]  ;;  %v308_v60 = vld [vmem:[#allocation8 + $0x138] sm:$0xff] }
  0x5b   :  { %208 = vmatpush2.msra.mxu0 %v145_v61  ;;  %365 = vmatprep.subr.mxu1 %v332_v24  ;;  %v307_v61 = vld [vmem:[#allocation8 + $0x130] sm:$0xff]  ;;  %v306_v62 = vld [vmem:[#allocation8 + $0x128] sm:$0xff]  ;;  %v304_v0 = vld [vmem:[#allocation8 + $0x118] sm:$0xff] }
  0x5c   :  { %209 = vmatprep.subr.mxu0 %v144_v63  ;;  %366 = vmatpush2.msra.mxu1 %v331_v26  ;;  %v305_v63 = vld [vmem:[#allocation8 + $0x120] sm:$0xff]  ;;  %v302_v2 = vld [vmem:[#allocation8 + $0x108] sm:$0xff] }
  0x5d   :  { %210 = vmatpush2.msra.mxu0 %v143_v1  ;;  %367 = vmatprep.subr.mxu1 %v330_v28  ;;  %v303_v1 = vld [vmem:[#allocation8 + $0x110] sm:$0xff] }
  0x5e   :  { %211 = vmatprep.subr.mxu0 %v142_v3  ;;  %368 = vmatpush2.msra.mxu1 %v329_v30  ;;  %v301_v3 = vld [vmem:[#allocation8 + $0x100] sm:$0xff] }
  0x5f   :  { %212 = vmatpush2.msra.mxu0 %v141_v5  ;;  %369 = vmatprep.subr.mxu1 %v328_v32  ;;  %v158_v5 = vshrl.u32 %v157_v4, 7 }
  0x60   :  { %213 = vmatprep.subr.mxu0 %v140_v7  ;;  %370 = vmatpush2.msra.mxu1 %v327_v34  ;;  %v155_v7 = vld [vmem:[%s675_s2] sm:$0x3] }
  0x61   :  { %214 = vmatpush2.msra.mxu0 %v139_v9  ;;  %371 = vmatprep.subr.mxu1 %v326_v42  ;;  %v159_v6 = vsub.s32 0, %v158_v5  ;;  %v163_v8 = vsub.s32 1, %v158_v5 }
  0x62   :  { %215 = vmatprep.subr.mxu0 %v138_v11  ;;  %372 = vmatpush2.msra.mxu1 %v325_v43  ;;  %v441_v43 = vld [vmem:[#allocation9] sm:$0xff] }
  0x63   :  { %216 = vmatpush2.msra.mxu0 %v137_v13  ;;  %373 = vmatprep.subr.mxu1 %v324_v44  ;;  %v160_v9 = vrot.slane %v155_v7, %v159_v6  ;;  %v164_v10 = vrot.slane %v155_v7, %v163_v8 }
  0x64   :  { %217 = vmatprep.subr.mxu0 %v136_v15  ;;  %374 = vmatpush2.msra.mxu1 %v323_v45 }
  0x65   :  { %218 = vmatpush2.msra.mxu0 %v135_v17  ;;  %375 = vmatprep.subr.mxu1 %v322_v46  ;;  %v442_v46 = vld [vmem:[#allocation9 + $0x8] sm:$0xff] }
  0x66   :  { %219 = vmatprep.subr.mxu0 %v134_v19  ;;  %376 = vmatpush2.msra.mxu1 %v321_v47 }
  0x67   :  { %220 = vmatpush2.msra.mxu0 %v133_v21  ;;  %377 = vmatprep.subr.mxu1 %v320_v48 }
  0x68   :  { %221 = vmatprep.subr.mxu0 %v132_v23  ;;  %378 = vmatpush2.msra.mxu1 %v319_v49 }
  0x69   :  { %222 = vmatpush2.msra.mxu0 %v131_v25  ;;  %379 = vmatprep.subr.mxu1 %v318_v50  ;;  %v443_v50 = vld [vmem:[#allocation9 + $0x10] sm:$0xff] }
  0x6a   :  { %223 = vmatprep.subr.mxu0 %v130_v27  ;;  %380 = vmatpush2.msra.mxu1 %v317_v51 }
  0x6b   :  { %224 = vmatpush2.msra.mxu0 %v129_v29  ;;  %381 = vmatprep.subr.mxu1 %v316_v52 }
  0x6c   :  { %225 = vmatprep.subr.mxu0 %v128_v31  ;;  %382 = vmatpush2.msra.mxu1 %v315_v53 }
  0x6d   :  { %226 = vmatpush2.msra.mxu0 %v127_v33  ;;  %383 = vmatprep.subr.mxu1 %v314_v54  ;;  %v444_v54 = vld [vmem:[#allocation9 + $0x18] sm:$0xff] }
  0x6e   :  { %227 = vmatprep.subr.mxu0 %v126_v35  ;;  %384 = vmatpush2.msra.mxu1 %v313_v55 }
  0x6f   :  { %228 = vmatpush2.msra.mxu0 %v125_v36  ;;  %385 = vmatprep.subr.mxu1 %v312_v56 }
  0x70   :  { %229 = vmatprep.subr.mxu0 %v124_v37  ;;  %386 = vmatpush2.msra.mxu1 %v311_v57 }
  0x71   :  { %230 = vmatpush2.msra.mxu0 %v123_v38  ;;  %387 = vmatprep.subr.mxu1 %v310_v58 }
  0x72   :  { %232 = vmatmul.mubr.f32.vlgmr.msra.gmra.mxu0 %v87_v39  ;;  %388 = vmatpush2.msra.mxu1 %v309_v59  ;;  %v425_v39 = vld [vmem:[%s677_s4] sm:$0x3]  ;;  %s567_s4 = scalar_lea.vmem %s459_s19, 512 }
  0x73   :  { %237 = vmatprep.mubr.f32.mxu0 %v90_v40  ;;  %389 = vmatprep.subr.mxu1 %v308_v60  ;;  %v430_v40 = vrot.slane %v425_v39, %v159_v6  ;;  %p568_p6 = scmp.ne.s32.totalorder %s459_s19, %s567_s4  ;;  %p573_p8 = scmp.lt.s32.totalorder %s567_s4, %s567_s4 }
  0x74   :  { %390 = vmatpush2.msra.mxu1 %v307_v61 }
  0x75   :  { %391 = vmatprep.subr.mxu1 %v306_v62  ;;  %p574_p9 = por %p573_p8, %p572_p7 }
  0x76   :  { %238 = vmatmul.mubr.f32.gmra.mxu0 %v89_v41  ;;  %392 = vmatpush2.msra.mxu1 %v305_v63  ;;  %v434_v41 = vrot.slane %v425_v39, %v163_v8 }
  0x77   :  { %393 = vmatprep.subr.mxu1 %v304_v0  ;;  %p575_p10 = pnand %p574_p9, %p568_p6 }
  0x78   :  { %394 = vmatpush2.msra.mxu1 %v303_v1 }
  0x79   :  { %395 = vmatprep.subr.mxu1 %v302_v2 }
  0x7a   :  { %396 = vmatpush2.msra.mxu1 %v301_v3 }
 0x132   :  { %v233_v11 = vpop.f32.mrf.mxu0 }
 0x133   :  { %v234_v12 = vadd.f32 %v233_v11, %v160_v9 }
 0x134   :  { %v235_v13 = vpop.f32.mrf.mxu0 }
 0x135   :  { %v249_v14 = vmul.f32 0.70710677, %v234_v12  ;;  %v236_v15 = vadd.f32 %v235_v13, %v164_v10  ;;  %v244_v29 = vmul.f32 0.5, %v234_v12 }
 0x136   :  { %v239_v16 = vpop.f32.mrf.mxu0 }
 0x137   :  { %479 = verf.f32 %v249_v14  ;;  %v250_v17 = vmul.f32 0.70710677, %v236_v15  ;;  %v240_v18 = vadd.f32 %v239_v16, %v160_v9  ;;  %v245_v26 = vmul.f32 0.5, %v236_v15 }
 0x138   :  { %v241_v19 = vpop.f32.mrf.mxu0 }
 0x139   :  { %481 = verf.f32 %v250_v17  ;;  %v251_v20 = vmul.f32 0.70710677, %v240_v18  ;;  %v242_v21 = vadd.f32 %v241_v19, %v164_v10  ;;  %v246_v36 = vmul.f32 0.5, %v240_v18 }
 0x13b   :  { %483 = verf.f32 %v251_v20  ;;  %v252_v22 = vmul.f32 0.70710677, %v242_v21  ;;  %v247_v34 = vmul.f32 0.5, %v242_v21 }
 0x13d   :  { %485 = verf.f32 %v252_v22 }
 0x144   :  { %v480_v23 = vpop.eup %479 }
 0x145   :  { %v257_v25 = vadd.f32 1.0, %v480_v23 }
 0x146   :  { %v482_v24 = vpop.eup %481 }
 0x147   :  { %v258_v27 = vadd.f32 1.0, %v482_v24  ;;  %v261_v32 = vmul.f32 %v257_v25, %v244_v29 }
 0x148   :  { %v484_v28 = vpop.eup %483 }
 0x149   :  { %v262_v30 = vmul.f32 %v258_v27, %v245_v26  ;;  %v259_v33 = vadd.f32 1.0, %v484_v28 }
 0x14a   :  { %v486_v31 = vpop.eup %485 }
 0x14b   :  { %397 = vmatprep.mubr.f32.mxu1 %v262_v30  ;;  %v260_v35 = vadd.f32 1.0, %v486_v31  ;;  %v263_v38 = vmul.f32 %v259_v33, %v246_v36 }
 0x14c   :  { %398 = vmatmul.mubr.f32.vlgmr.msra.gmra.mxu1 %v261_v32 }
 0x14d   :  { %v264_v37 = vmul.f32 %v260_v35, %v247_v34 }
 0x14f   :  { %403 = vmatprep.mubr.f32.mxu1 %v264_v37 }
 0x150   :  { %404 = vmatmul.mubr.f32.gmra.mxu1 %v263_v38 }
 0x20c   :  { %v399_v42 = vpop.f32.mrf.mxu1 }
 0x20d   :  { %v437_v44 = vadd.f32 %v430_v40, %v399_v42 }
 0x20e   :  { %v401_v45 = vpop.f32.mrf.mxu1 }
 0x20f   :  { %v445_v47 = vadd.f32 %v441_v43, %v437_v44  ;;  %v438_v48 = vadd.f32 %v434_v41, %v401_v45 }
 0x210   :  { %v405_v49 = vpop.f32.mrf.mxu1 }
 0x211   :  { %449 = vst [vmem:[#allocation11] sm:$0xff] %v445_v47  ;;  %v446_v51 = vadd.f32 %v442_v46, %v438_v48  ;;  %v439_v52 = vadd.f32 %v430_v40, %v405_v49 }
 0x212   :  { %v407_v53 = vpop.f32.mrf.mxu1 }
 0x213   :  { %450 = vst [vmem:[#allocation11 + $0x8] sm:$0xff] %v446_v51  ;;  %v447_v55 = vadd.f32 %v443_v50, %v439_v52  ;;  %v440_v56 = vadd.f32 %v434_v41, %v407_v53 }
 0x215   :  { %451 = vst [vmem:[#allocation11 + $0x10] sm:$0xff] %v447_v55  ;;  %v448_v57 = vadd.f32 %v444_v54, %v440_v56 }
 0x217   :  { %452 = vst [vmem:[#allocation11 + $0x18] sm:$0xff] %v448_v57 }
 0x218   :  { %578 = shalt.err (!%p575_p10)
}
 0x219   :  { %464 = dma.vmem_to_hbm [thread:$0]  %s459_s19, 512, %s679_s6, [#allocation5], %s597_s26, %s597_s26, %s598_s27  }
 0x21a   :  { %593 = dma.done.wait [#allocation5], 512  }
 0x21b   :  { %594 = vsyncadd [#allocation5], 4294966784 }
 0x21c   :  { %468 = vsyncpa [#allocation4], 1 }
 0x21d   :  { %469 = vsyncpa [#allocation7], 1 }
 0x21e   :  { %470 = vsyncpa [#allocation10], 1 }
 0x21f   :  { %471 = vsyncpa [#allocation5], 1 }

</bundles_post_ra>
